<compile_context>
chip_gen: v6e
topology: v6e:2x2x1
jax: 0.10.0
libtpu: 0.0.40
codegen_flags: <defaults>
</compile_context>

<pallas_src>
import functools
from typing import NamedTuple, Tuple

import jax
import jax.numpy as jnp
from jax.experimental import pallas as pl
from jax.experimental.pallas import tpu as pltpu


# ----------------------------------------------------------------------------
# Static configuration (never passed through jit -> no traced strides).
# ----------------------------------------------------------------------------
class DQNConfig(NamedTuple):
    in_channels: int = 3
    out_channel: int = 16
    shape_input: Tuple[int, int] = (84, 84)
    kernel: Tuple[int, int] = (8, 8)
    stride: Tuple[int, int] = (4, 4)
    out_features_linear: int = 256
    number_actions: int = 4
    scale_batch_input: float = 1.0


def _conv_sizes(cfg: DQNConfig):
    kh1, kw1 = cfg.kernel
    sh1, sw1 = cfg.stride
    kh2, kw2 = kh1 // 2, kw1 // 2
    sh2, sw2 = sh1 // 2, sw1 // 2
    h1 = (cfg.shape_input[0] - kh1) // sh1 + 1
    w1 = (cfg.shape_input[1] - kw1) // sw1 + 1
    h2 = (h1 - kh2) // sh2 + 1
    w2 = (w1 - kw2) // sw2 + 1
    return (kh1, kw1, sh1, sw1, h1, w1), (kh2, kw2, sh2, sw2, h2, w2)


# ----------------------------------------------------------------------------
# Kernel 1: conv1 as im2col matmul + bias + ReLU (M-tiled, parallel grid axis).
# ----------------------------------------------------------------------------
def _conv1_matmul_kernel(p_ref, w_ref, b_ref, o_ref):
    acc = jnp.dot(p_ref[...], w_ref[...], preferred_element_type=jnp.float32)
    o_ref[...] = jnp.maximum(acc + b_ref[...], 0.0).astype(o_ref.dtype)


def conv1_matmul(patches, w_mat, bias, *, tile_m: int = 512):
    """patches: (M, K) bf16, w_mat: (K, N) bf16, bias: (1, N) f32 -> (M, N) bf16."""
    M, K = patches.shape
    N = w_mat.shape[1]
    tm = M if M <= tile_m else tile_m          # full block at small M, tiled otherwise
    return pl.pallas_call(
        _conv1_matmul_kernel,
        out_shape=jax.ShapeDtypeStruct((M, N), jnp.bfloat16),
        grid=(pl.cdiv(M, tm),),
        in_specs=[
            pl.BlockSpec((tm, K), lambda i: (i, 0)),
            pl.BlockSpec((K, N), lambda i: (0, 0)),
            pl.BlockSpec((1, N), lambda i: (0, 0)),
        ],
        out_specs=pl.BlockSpec((tm, N), lambda i: (i, 0)),
        compiler_params=pltpu.CompilerParams(
            dimension_semantics=("parallel",),
            vmem_limit_bytes=32 * 1024 * 1024),
    )(patches, w_mat, bias)


# ----------------------------------------------------------------------------
# Kernel 2: fused tail = conv2 matmul + ReLU + fc1 + ReLU + fc2 in one call.
# Grid iterates over the S2 = OH2*OW2 spatial positions of conv2; the fc1
# accumulator (B, 256) lives in a VMEM scratch across the whole grid.
# ----------------------------------------------------------------------------
def _tail_kernel(p2_ref, w2_ref, b2_ref, wl1_ref, bl1_ref, wl2_ref, bl2_ref,
                 q_ref, acc_ref):
    s = pl.program_id(0)

    @pl.when(s == 0)
    def _init():
        acc_ref[...] = jnp.zeros_like(acc_ref)

    # conv2 for spatial position s, all batch rows at once: (B, K2) @ (K2, OC2)
    h = jnp.dot(p2_ref[0], w2_ref[...], preferred_element_type=jnp.float32)
    h = jnp.maximum(h + b2_ref[...], 0.0)                       # (B, OC2) f32

    # fc1 contribution of this spatial block (K-blocked accumulation in VMEM).
    acc_ref[...] += jnp.dot(h.astype(jnp.bfloat16), wl1_ref[0],
                            preferred_element_type=jnp.float32)

    @pl.when(s == pl.num_programs(0) - 1)
    def _finalize():
        hidden = jnp.maximum(acc_ref[...] + bl1_ref[...], 0.0)  # (B, 256) f32
        q = jnp.dot(hidden.astype(jnp.bfloat16), wl2_ref[...],
                    preferred_element_type=jnp.float32) + bl2_ref[...]
        q_ref[...] = q.astype(q_ref.dtype)


def fused_tail(p2, w2_mat, b2, wl1_3d, bl1, wl2, bl2):
    """p2: (S2, B, K2) bf16; weights bf16; biases f32 -> q: (B, A) f32."""
    S2, B, K2 = p2.shape
    OC2 = w2_mat.shape[1]
    H, A = wl2.shape
    return pl.pallas_call(
        _tail_kernel,
        out_shape=jax.ShapeDtypeStruct((B, A), jnp.float32),
        grid=(S2,),
        in_specs=[
            pl.BlockSpec((1, B, K2), lambda s: (s, 0, 0)),
            pl.BlockSpec((K2, OC2), lambda s: (0, 0)),
            pl.BlockSpec((1, OC2), lambda s: (0, 0)),
            pl.BlockSpec((1, OC2, H), lambda s: (s, 0, 0)),
            pl.BlockSpec((1, H), lambda s: (0, 0)),
            pl.BlockSpec((H, A), lambda s: (0, 0)),
            pl.BlockSpec((1, A), lambda s: (0, 0)),
        ],
        out_specs=pl.BlockSpec((B, A), lambda s: (0, 0)),
        scratch_shapes=[pltpu.VMEM((B, H), jnp.float32)],
        compiler_params=pltpu.CompilerParams(
            dimension_semantics=("arbitrary",),
            vmem_limit_bytes=32 * 1024 * 1024),
    )(p2, w2_mat, b2, wl1_3d, bl1, wl2, bl2)


# ----------------------------------------------------------------------------
# JAX glue: patch extraction (static slicing only; strides are Python ints).
# ----------------------------------------------------------------------------
def _im2col_nchw(x, kh, kw, sh, sw):
    """x: (B, C, H, W) -> (B*OH*OW, C*kh*kw); features ordered (c, kh, kw)."""
    B, C, H, W = x.shape
    OH = (H - kh) // sh + 1
    OW = (W - kw) // sw + 1
    cols = []
    for i in range(kh):
        for j in range(kw):
            cols.append(x[:, :, i:i + sh * OH:sh, j:j + sw * OW:sw])  # (B,C,OH,OW)
    p = jnp.stack(cols, axis=2)                      # (B, C, kh*kw, OH, OW)
    p = p.reshape(B, C * kh * kw, OH, OW)
    return p.transpose(0, 2, 3, 1).reshape(B * OH * OW, C * kh * kw)


def _im2col_nhwc_grouped(a, kh, kw, sh, sw):
    """a: (B, H, W, C) NHWC -> (OH*OW, B, kh*kw*C); features ordered (kh, kw, c).
    Rows are grouped spatial-major so the fused tail kernel can take one
    per-spatial-position (B, K2) block per grid step."""
    B, H, W, C = a.shape
    OH = (H - kh) // sh + 1
    OW = (W - kw) // sw + 1
    taps = []
    for i in range(kh):
        for j in range(kw):
            taps.append(a[:, i:i + sh * OH:sh, j:j + sw * OW:sw, :])  # (B,OH,OW,C)
    p = jnp.stack(taps, axis=3)                      # (B, OH, OW, kh*kw, C)
    p = p.reshape(B, OH, OW, kh * kw * C)
    return p.transpose(1, 2, 0, 3).reshape(OH * OW, B, kh * kw * C)


# ----------------------------------------------------------------------------
# Parameters: PyTorch-layout init + one-time packing into kernel-ready layouts.
# ----------------------------------------------------------------------------
def _uniform(key, shape, fan_in):
    bound = 1.0 / jnp.sqrt(jnp.float32(fan_in))
    return jax.random.uniform(key, shape, jnp.float32, -bound, bound)


def init_params(key, cfg: DQNConfig):
    (kh1, kw1, _, _, _, _), (kh2, kw2, _, _, h2, w2) = _conv_sizes(cfg)
    C, OC1 = cfg.in_channels, cfg.out_channel
    OC2 = 2 * OC1
    in_feat = OC2 * h2 * w2
    H, A = cfg.out_features_linear, cfg.number_actions
    ks = jax.random.split(key, 8)
    fan1 = C * kh1 * kw1
    fan2 = OC1 * kh2 * kw2
    return dict(
        w1=_uniform(ks[0], (OC1, C, kh1, kw1), fan1),
        b1=_uniform(ks[1], (OC1,), fan1),
        w2=_uniform(ks[2], (OC2, OC1, kh2, kw2), fan2),
        b2=_uniform(ks[3], (OC2,), fan2),
        wl1=_uniform(ks[4], (in_feat, H), in_feat),   # stored (in, out)
        bl1=_uniform(ks[5], (H,), in_feat),
        wl2=_uniform(ks[6], (H, A), H),
        bl2=_uniform(ks[7], (A,), H),
    )


def pack_params(params, cfg: DQNConfig):
    (kh1, kw1, _, _, _, _), (kh2, kw2, _, _, h2, w2) = _conv_sizes(cfg)
    C, OC1 = cfg.in_channels, cfg.out_channel
    OC2 = 2 * OC1
    S2 = h2 * w2
    H, A = cfg.out_features_linear, cfg.number_actions

    # conv1: fold the input scaling into the weights; K ordered (c, kh, kw).
    w1_mat = (params["w1"].reshape(OC1, C * kh1 * kw1).T
              / jnp.float32(cfg.scale_batch_input)).astype(jnp.bfloat16)
    # conv2 as a matmul on NHWC patches: K ordered (kh, kw, c).
    w2_mat = params["w2"].transpose(2, 3, 1, 0).reshape(kh2 * kw2 * OC1, OC2)
    w2_mat = w2_mat.astype(jnp.bfloat16)
    # fc1: PyTorch flattens NCHW (feature index = c*S2 + s). Regroup rows into
    # per-spatial-position (OC2, H) blocks so the NHWC conv2 output is consumed
    # directly — the activation permutation becomes a free weight permutation.
    wl1_3d = params["wl1"].reshape(OC2, S2, H).transpose(1, 0, 2).astype(jnp.bfloat16)

    return dict(
        w1_mat=w1_mat, b1=params["b1"].reshape(1, OC1).astype(jnp.float32),
        w2_mat=w2_mat, b2=params["b2"].reshape(1, OC2).astype(jnp.float32),
        wl1_3d=wl1_3d, bl1=params["bl1"].reshape(1, H).astype(jnp.float32),
        wl2=params["wl2"].astype(jnp.bfloat16),
        bl2=params["bl2"].reshape(1, A).astype(jnp.float32),
    )


# ----------------------------------------------------------------------------
# Forward builder (all shape/stride constants are closed over, never traced).
# ----------------------------------------------------------------------------
def make_dqn_forward(cfg: DQNConfig):
    (kh1, kw1, sh1, sw1, h1, w1), (kh2, kw2, sh2, sw2, _, _) = _conv_sizes(cfg)
    OC1 = cfg.out_channel

    def forward(packed, x):
        B = x.shape[0]
        xb = x.astype(jnp.bfloat16)                     # /scale folded into w1_mat
        p1 = _im2col_nchw(xb, kh1, kw1, sh1, sw1)       # (B*h1*w1, C*kh1*kw1)
        a1 = conv1_matmul(p1, packed["w1_mat"], packed["b1"])   # (B*h1*w1, OC1) bf16
        a1 = a1.reshape(B, h1, w1, OC1)                 # NHWC — no transpose needed
        p2 = _im2col_nhwc_grouped(a1, kh2, kw2, sh2, sw2)       # (S2, B, K2) bf16
        q = fused_tail(p2, packed["w2_mat"], packed["b2"],
                       packed["wl1_3d"], packed["bl1"],
                       packed["wl2"], packed["bl2"])            # (B, A) f32
        return q

    return forward


# ----------------------------------------------------------------------------
# Pure-JAX references for the correctness check.
# ----------------------------------------------------------------------------
def dqn_forward_ref(params, x, cfg: DQNConfig, *, mimic_kernel_precision=False):
    (_, _, sh1, sw1, _, _), (_, _, sh2, sw2, _, _) = _conv_sizes(cfg)
    if mimic_kernel_precision:
        cast = lambda a: a.astype(jnp.bfloat16)
        x0 = cast(x)
        w1 = cast(params["w1"] / jnp.float32(cfg.scale_batch_input))
    else:
        cast = lambda a: a.astype(jnp.float32)
        x0 = x.astype(jnp.float32) / jnp.float32(cfg.scale_batch_input)
        w1 = params["w1"]

    def conv(inp, w, b, stride):
        y = jax.lax.conv_general_dilated(
            inp, w, window_strides=stride, padding="VALID",
            dimension_numbers=("NCHW", "OIHW", "NCHW"),
            preferred_element_type=jnp.float32)
        return jnp.maximum(y + b[None, :, None, None], 0.0)

    a1 = conv(x0, w1, params["b1"], (sh1, sw1))
    a2 = conv(cast(a1), cast(params["w2"]), params["b2"], (sh2, sw2))
    flat = a2.reshape(a2.shape[0], -1)                    # NCHW flatten, like torch
    h = jnp.maximum(jnp.dot(cast(flat), cast(params["wl1"]),
                            preferred_element_type=jnp.float32) + params["bl1"], 0.0)
    return jnp.dot(cast(h), cast(params["wl2"]),
                   preferred_element_type=jnp.float32) + params["bl2"]


if __name__ == "__main__":
    # Small-but-consistent shapes: batch=2, 3 channels, 32x32 frames.
    # conv1 8x8/s4 -> 7x7x16 ; conv2 4x4/s2 -> 2x2x32 ; flatten 128 -> 256 -> 4.
    cfg = DQNConfig(in_channels=3, out_channel=16, shape_input=(32, 32),
                    kernel=(8, 8), stride=(4, 4), out_features_linear=256,
                    number_actions=4, scale_batch_input=255.0)
    B = 2

    key = jax.random.PRNGKey(0)
    k_param, k_x = jax.random.split(key)
    params = init_params(k_param, cfg)
    x = jax.random.uniform(k_x, (B, cfg.in_channels, *cfg.shape_input),
                           jnp.float32, 0.0, 255.0)

    packed = pack_params(params, cfg)
    fwd = jax.jit(make_dqn_forward(cfg))
    q = jax.block_until_ready(fwd(packed, x))
    assert q.shape == (B, cfg.number_actions)

    # Tight check vs. a reference that mirrors the kernel's bf16-input/f32-accum math.
    q_bf16 = dqn_forward_ref(params, x, cfg, mimic_kernel_precision=True)
    assert jnp.allclose(q, q_bf16, atol=5e-3, rtol=5e-2), "mismatch vs bf16 reference"

    # Loose sanity check vs. full-f32 PyTorch-equivalent math.
    q_f32 = dqn_forward_ref(params, x, cfg, mimic_kernel_precision=False)
    assert jnp.allclose(q, q_f32, atol=3e-2, rtol=3e-2), "mismatch vs f32 reference"

    print("KERNEL_OK")
</pallas_src>

<mosaic_0001>
module attributes {stable_mosaic.version = 11 : i64} {
  func.func @_conv1_matmul_kernel(%arg0: i32, %arg1: memref<98x192xbf16, #tpu.memory_space<vmem>>, %arg2: memref<192x16xbf16, #tpu.memory_space<vmem>>, %arg3: memref<1x16xf32, #tpu.memory_space<vmem>>, %arg4: memref<98x16xbf16, #tpu.memory_space<vmem>>) attributes {dimension_semantics = [#tpu.dimension_semantics<parallel>], iteration_bounds = array<i64: 1>, scalar_prefetch = 0 : i64, scratch_operands = 0 : i64, tpu.core_type = #tpu.core_type<tc>, window_params = [{transform_indices = @transform_0, window_bounds = array<i64: 98, 192>}, {pipeline_mode = #tpu.pipeline_mode<synchronous>, transform_indices = @transform_1, window_bounds = array<i64: 192, 16>}, {pipeline_mode = #tpu.pipeline_mode<synchronous>, transform_indices = @transform_2, window_bounds = array<i64: 1, 16>}, {transform_indices = @transform_3, window_bounds = array<i64: 98, 16>}]} {
    %c0 = arith.constant 0 : index
    %c0_0 = arith.constant 0 : index
    %0 = vector.load %arg1[%c0, %c0_0] : memref<98x192xbf16, #tpu.memory_space<vmem>>, vector<98x192xbf16>
    %c0_1 = arith.constant 0 : index
    %c0_2 = arith.constant 0 : index
    %1 = vector.load %arg2[%c0_1, %c0_2] : memref<192x16xbf16, #tpu.memory_space<vmem>>, vector<192x16xbf16>
    %cst = arith.constant dense<0.000000e+00> : vector<98x16xf32>
    %2 = tpu.matmul %0, %1, %cst {dimension_numbers = #tpu.dot_dimension_numbers<[1], [0], [0], [1], [0, 0, 1, 1], [], []>} : vector<98x192xbf16>, vector<192x16xbf16>, vector<98x16xf32> -> vector<98x16xf32>
    %c0_3 = arith.constant 0 : index
    %c0_4 = arith.constant 0 : index
    %3 = vector.load %arg3[%c0_3, %c0_4] : memref<1x16xf32, #tpu.memory_space<vmem>>, vector<1x16xf32>
    %4 = vector.broadcast %3 : vector<1x16xf32> to vector<98x16xf32>
    %5 = arith.addf %2, %4 : vector<98x16xf32>
    %cst_5 = arith.constant 0.000000e+00 : f32
    %6 = vector.broadcast %cst_5 : f32 to vector<98x16xf32>
    %7 = arith.maximumf %5, %6 : vector<98x16xf32>
    %8 = arith.truncf %7 : vector<98x16xf32> to vector<98x16xbf16>
    %c0_6 = arith.constant 0 : index
    %c0_7 = arith.constant 0 : index
    %9 = vector.load %arg4[%c0_6, %c0_7] : memref<98x16xbf16, #tpu.memory_space<vmem>>, vector<98x16xbf16>
    tpu.vector_store %arg4[%c0_6, %c0_7], %8 {strides = array<i32>} : memref<98x16xbf16, #tpu.memory_space<vmem>>, vector<98x16xbf16>,
    return
  }
  func.func @transform_0(%arg0: i32) -> (i32, i32) {
    %c0_i32 = arith.constant 0 : i32
    %c0_i32_0 = arith.constant 0 : i32
    return %arg0, %c0_i32 : i32, i32
  }
  func.func @transform_1(%arg0: i32) -> (i32, i32) {
    %c0_i32 = arith.constant 0 : i32
    %c0_i32_0 = arith.constant 0 : i32
    %c0_i32_1 = arith.constant 0 : i32
    return %c0_i32, %c0_i32_0 : i32, i32
  }
  func.func @transform_2(%arg0: i32) -> (i32, i32) {
    %c0_i32 = arith.constant 0 : i32
    %c0_i32_0 = arith.constant 0 : i32
    %c0_i32_1 = arith.constant 0 : i32
    return %c0_i32, %c0_i32_0 : i32, i32
  }
  func.func @transform_3(%arg0: i32) -> (i32, i32) {
    %c0_i32 = arith.constant 0 : i32
    %c0_i32_0 = arith.constant 0 : i32
    return %arg0, %c0_i32 : i32, i32
  }
}

module attributes {stable_mosaic.version = 11 : i64} {
  func.func @_tail_kernel(%arg0: i32, %arg1: memref<1x2x256xbf16, #tpu.memory_space<vmem>>, %arg2: memref<256x32xbf16, #tpu.memory_space<vmem>>, %arg3: memref<1x32xf32, #tpu.memory_space<vmem>>, %arg4: memref<1x32x256xbf16, #tpu.memory_space<vmem>>, %arg5: memref<1x256xf32, #tpu.memory_space<vmem>>, %arg6: memref<256x4xbf16, #tpu.memory_space<vmem>>, %arg7: memref<1x4xf32, #tpu.memory_space<vmem>>, %arg8: memref<2x4xf32, #tpu.memory_space<vmem>>, %arg9: memref<2x256xf32, #tpu.memory_space<vmem>>) attributes {dimension_semantics = [#tpu.dimension_semantics<arbitrary>], iteration_bounds = array<i64: 4>, scalar_prefetch = 0 : i64, scratch_operands = 1 : i64, tpu.core_type = #tpu.core_type<tc>, window_params = [{transform_indices = @transform_0, window_bounds = array<i64: 1, 2, 256>}, {pipeline_mode = #tpu.pipeline_mode<synchronous>, transform_indices = @transform_1, window_bounds = array<i64: 256, 32>}, {pipeline_mode = #tpu.pipeline_mode<synchronous>, transform_indices = @transform_2, window_bounds = array<i64: 1, 32>}, {transform_indices = @transform_3, window_bounds = array<i64: 1, 32, 256>}, {pipeline_mode = #tpu.pipeline_mode<synchronous>, transform_indices = @transform_4, window_bounds = array<i64: 1, 256>}, {pipeline_mode = #tpu.pipeline_mode<synchronous>, transform_indices = @transform_5, window_bounds = array<i64: 256, 4>}, {pipeline_mode = #tpu.pipeline_mode<synchronous>, transform_indices = @transform_6, window_bounds = array<i64: 1, 4>}, {pipeline_mode = #tpu.pipeline_mode<synchronous>, transform_indices = @transform_7, window_bounds = array<i64: 2, 4>}]} {
    %c0_i32 = arith.constant 0 : i32
    %0 = arith.cmpi eq, %arg0, %c0_i32 : i32
    %1 = arith.extui %0 : i1 to i32
    %c0_i32_0 = arith.constant 0 : i32
    %2 = arith.cmpi ne, %1, %c0_i32_0 : i32
    scf.if %2 {
      %cst_17 = arith.constant 0.000000e+00 : f32
      %22 = vector.broadcast %cst_17 : f32 to vector<2x256xf32>
      %c0_18 = arith.constant 0 : index
      %c0_19 = arith.constant 0 : index
      %23 = vector.load %arg9[%c0_18, %c0_19] : memref<2x256xf32, #tpu.memory_space<vmem>>, vector<2x256xf32>
      tpu.vector_store %arg9[%c0_18, %c0_19], %22 {strides = array<i32>} : memref<2x256xf32, #tpu.memory_space<vmem>>, vector<2x256xf32>,
    } else {
    }
    %c0 = arith.constant 0 : index
    %c0_1 = arith.constant 0 : index
    %c0_2 = arith.constant 0 : index
    %3 = vector.load %arg1[%c0, %c0_1, %c0_2] : memref<1x2x256xbf16, #tpu.memory_space<vmem>>, vector<1x2x256xbf16>
    %4 = vector.shape_cast %3 : vector<1x2x256xbf16> to vector<2x256xbf16>
    %c0_3 = arith.constant 0 : index
    %c0_4 = arith.constant 0 : index
    %5 = vector.load %arg2[%c0_3, %c0_4] : memref<256x32xbf16, #tpu.memory_space<vmem>>, vector<256x32xbf16>
    %cst = arith.constant dense<0.000000e+00> : vector<2x32xf32>
    %6 = tpu.matmul %4, %5, %cst {dimension_numbers = #tpu.dot_dimension_numbers<[1], [0], [0], [1], [0, 0, 1, 1], [], []>} : vector<2x256xbf16>, vector<256x32xbf16>, vector<2x32xf32> -> vector<2x32xf32>
    %c0_5 = arith.constant 0 : index
    %c0_6 = arith.constant 0 : index
    %7 = vector.load %arg3[%c0_5, %c0_6] : memref<1x32xf32, #tpu.memory_space<vmem>>, vector<1x32xf32>
    %8 = vector.broadcast %7 : vector<1x32xf32> to vector<2x32xf32>
    %9 = arith.addf %6, %8 : vector<2x32xf32>
    %cst_7 = arith.constant 0.000000e+00 : f32
    %10 = vector.broadcast %cst_7 : f32 to vector<2x32xf32>
    %11 = arith.maximumf %9, %10 : vector<2x32xf32>
    %c0_8 = arith.constant 0 : index
    %c0_9 = arith.constant 0 : index
    %12 = vector.load %arg9[%c0_8, %c0_9] : memref<2x256xf32, #tpu.memory_space<vmem>>, vector<2x256xf32>
    %13 = arith.truncf %11 : vector<2x32xf32> to vector<2x32xbf16>
    %c0_10 = arith.constant 0 : index
    %c0_11 = arith.constant 0 : index
    %c0_12 = arith.constant 0 : index
    %14 = vector.load %arg4[%c0_10, %c0_11, %c0_12] : memref<1x32x256xbf16, #tpu.memory_space<vmem>>, vector<1x32x256xbf16>
    %15 = vector.shape_cast %14 : vector<1x32x256xbf16> to vector<32x256xbf16>
    %cst_13 = arith.constant dense<0.000000e+00> : vector<2x256xf32>
    %16 = tpu.matmul %13, %15, %cst_13 {dimension_numbers = #tpu.dot_dimension_numbers<[1], [0], [0], [1], [0, 0, 1, 1], [], []>} : vector<2x32xbf16>, vector<32x256xbf16>, vector<2x256xf32> -> vector<2x256xf32>
    %17 = arith.addf %12, %16 : vector<2x256xf32>
    %c0_14 = arith.constant 0 : index
    %c0_15 = arith.constant 0 : index
    %18 = vector.load %arg9[%c0_14, %c0_15] : memref<2x256xf32, #tpu.memory_space<vmem>>, vector<2x256xf32>
    tpu.vector_store %arg9[%c0_14, %c0_15], %17 {strides = array<i32>} : memref<2x256xf32, #tpu.memory_space<vmem>>, vector<2x256xf32>,
    %c3_i32 = arith.constant 3 : i32
    %19 = arith.cmpi eq, %arg0, %c3_i32 : i32
    %20 = arith.extui %19 : i1 to i32
    %c0_i32_16 = arith.constant 0 : i32
    %21 = arith.cmpi ne, %20, %c0_i32_16 : i32
    scf.if %21 {
      %c0_17 = arith.constant 0 : index
      %c0_18 = arith.constant 0 : index
      %22 = vector.load %arg9[%c0_17, %c0_18] : memref<2x256xf32, #tpu.memory_space<vmem>>, vector<2x256xf32>
      %c0_19 = arith.constant 0 : index
      %c0_20 = arith.constant 0 : index
      %23 = vector.load %arg5[%c0_19, %c0_20] : memref<1x256xf32, #tpu.memory_space<vmem>>, vector<1x256xf32>
      %24 = vector.broadcast %23 : vector<1x256xf32> to vector<2x256xf32>
      %25 = arith.addf %22, %24 : vector<2x256xf32>
      %cst_21 = arith.constant 0.000000e+00 : f32
      %26 = vector.broadcast %cst_21 : f32 to vector<2x256xf32>
      %27 = arith.maximumf %25, %26 : vector<2x256xf32>
      %28 = arith.truncf %27 : vector<2x256xf32> to vector<2x256xbf16>
      %c0_22 = arith.constant 0 : index
      %c0_23 = arith.constant 0 : index
      %29 = vector.load %arg6[%c0_22, %c0_23] : memref<256x4xbf16, #tpu.memory_space<vmem>>, vector<256x4xbf16>
      %cst_24 = arith.constant dense<0.000000e+00> : vector<2x4xf32>
      %30 = tpu.matmul %28, %29, %cst_24 {dimension_numbers = #tpu.dot_dimension_numbers<[1], [0], [0], [1], [0, 0, 1, 1], [], []>} : vector<2x256xbf16>, vector<256x4xbf16>, vector<2x4xf32> -> vector<2x4xf32>
      %c0_25 = arith.constant 0 : index
      %c0_26 = arith.constant 0 : index
      %31 = vector.load %arg7[%c0_25, %c0_26] : memref<1x4xf32, #tpu.memory_space<vmem>>, vector<1x4xf32>
      %32 = vector.broadcast %31 : vector<1x4xf32> to vector<2x4xf32>
      %33 = arith.addf %30, %32 : vector<2x4xf32>
      %c0_27 = arith.constant 0 : index
      %c0_28 = arith.constant 0 : index
      %34 = vector.load %arg8[%c0_27, %c0_28] : memref<2x4xf32, #tpu.memory_space<vmem>>, vector<2x4xf32>
      tpu.vector_store %arg8[%c0_27, %c0_28], %33 {strides = array<i32>} : memref<2x4xf32, #tpu.memory_space<vmem>>, vector<2x4xf32>,
    } else {
    }
    return
  }
  func.func @transform_0(%arg0: i32) -> (i32, i32, i32) {
    %c0_i32 = arith.constant 0 : i32
    %c0_i32_0 = arith.constant 0 : i32
    %c0_i32_1 = arith.constant 0 : i32
    return %arg0, %c0_i32, %c0_i32_0 : i32, i32, i32
  }
  func.func @transform_1(%arg0: i32) -> (i32, i32) {
    %c0_i32 = arith.constant 0 : i32
    %c0_i32_0 = arith.constant 0 : i32
    %c0_i32_1 = arith.constant 0 : i32
    return %c0_i32, %c0_i32_0 : i32, i32
  }
  func.func @transform_2(%arg0: i32) -> (i32, i32) {
    %c0_i32 = arith.constant 0 : i32
    %c0_i32_0 = arith.constant 0 : i32
    %c0_i32_1 = arith.constant 0 : i32
    return %c0_i32, %c0_i32_0 : i32, i32
  }
  func.func @transform_3(%arg0: i32) -> (i32, i32, i32) {
    %c0_i32 = arith.constant 0 : i32
    %c0_i32_0 = arith.constant 0 : i32
    %c0_i32_1 = arith.constant 0 : i32
    return %arg0, %c0_i32, %c0_i32_0 : i32, i32, i32
  }
  func.func @transform_4(%arg0: i32) -> (i32, i32) {
    %c0_i32 = arith.constant 0 : i32
    %c0_i32_0 = arith.constant 0 : i32
    %c0_i32_1 = arith.constant 0 : i32
    return %c0_i32, %c0_i32_0 : i32, i32
  }
  func.func @transform_5(%arg0: i32) -> (i32, i32) {
    %c0_i32 = arith.constant 0 : i32
    %c0_i32_0 = arith.constant 0 : i32
    %c0_i32_1 = arith.constant 0 : i32
    return %c0_i32, %c0_i32_0 : i32, i32
  }
  func.func @transform_6(%arg0: i32) -> (i32, i32) {
    %c0_i32 = arith.constant 0 : i32
    %c0_i32_0 = arith.constant 0 : i32
    %c0_i32_1 = arith.constant 0 : i32
    return %c0_i32, %c0_i32_0 : i32, i32
  }
  func.func @transform_7(%arg0: i32) -> (i32, i32) {
    %c0_i32 = arith.constant 0 : i32
    %c0_i32_0 = arith.constant 0 : i32
    %c0_i32_1 = arith.constant 0 : i32
    return %c0_i32, %c0_i32_0 : i32, i32
  }
}

</mosaic_0001>

<bundles_post_ra>
// kernel: forward.2
= control target key start
LH: loop header
LB: loop body
LE: loop exit
PB: predicated region body
PF: predicated region fallthrough
CT: control target
= control target key end

     0   :  { %v503_v0 = vmov 0   ;;  %vm191_vm0 = vcmask 523264   ;;  %vm367_vm1 = vcmask 125952   ;;  %vm380_vm2 = vcmask 122880   ;;  %s699_s1 = inlined_call_operand.vmem [shape: bf16[192,16], index: 1, kind: input, shape index: {}]   ;;  %s700_s0 = inlined_call_operand.vmem [shape: bf16[98,192], index: 0, kind: input, shape index: {}]   ;;  %s701_s2 = inlined_call_operand.vmem [shape: f32[1,16], index: 2, kind: input, shape index: {}]   ;;  %s702_s3 = inlined_call_operand.vmem [shape: bf16[98,16], index: 3, kind: output, shape index: {}]  }
   0x1   :  { %213 = vmatprep.subr.bf16.mxu0 %v503_v0  ;;  %v471_v1 = vld [vmem:[%s699_s1 + $0x38] sm:$0xff]   ;;  %446 = vmatprep.subr.bf16.mxu1 %v503_v0  ;;  %v472_v2 = vld [vmem:[%s699_s1 + $0x30] sm:$0xff]   ;;  %v473_v3 = vld [vmem:[%s699_s1 + $0x28] sm:$0xff]  }
   0x2   :  { %214 = vmatpush1.bf16.msra.mxu0 %v471_v1  ;;  %458 = vmatpush1.bf16.msra.mxu1 %v471_v1  ;;  %v474_v4 = vld [vmem:[%s699_s1 + $0x20] sm:$0xff]   ;;  %v475_v6 = vld [vmem:[%s699_s1 + $0x18] sm:$0xff]   ;;  %v476_v8 = vld [vmem:[%s699_s1 + $0x10] sm:$0xff]  }
   0x3   :  { %215 = vmatprep.subr.bf16.mxu0 %v503_v0  ;;  %447 = vmatprep.subr.bf16.mxu1 %v503_v0  ;;  %v485_v5 = vld [vmem:[%s700_s0 + $0x4] ss:$8 sps:$4 sm:$0xff]   ;;  %v479_v11 = vld [vmem:[%s699_s1 + $0x58] sm:$0xff]   ;;  %v480_v12 = vld [vmem:[%s699_s1 + $0x50] sm:$0xff]  }
   0x4   :  { %v488_v7 = vld [vmem:[%s700_s0 + $0x44] ss:$8 sps:$4 sm:$0xff]   ;;  %413 = vmatprep.mubr.msk.bf16.mxu0 %vm191_vm0, %v485_v5  ;;  %v483_v15 = vld [vmem:[%s700_s0] ss:$8 sps:$4 sm:$0xff]   ;;  %v489_v17 = vld [vmem:[%s700_s0 + $0x14] ss:$8 sps:$4 sm:$0xff]  }
   0x5   :  { %417 = vmatprep.mubr.msk.bf16.mxu1 %vm191_vm0, %v488_v7  ;;  %v477_v9 = vld [vmem:[%s699_s1 + $0x8] sm:$0xff]   ;;  %v478_v10 = vld [vmem:[%s699_s1] sm:$0xff]   ;;  %v492_v18 = vld [vmem:[%s700_s0 + $0x54] ss:$8 sps:$4 sm:$0xff]  }
   0x6   :  { %216 = vmatpush1.bf16.msra.mxu0 %v472_v2  ;;  %459 = vmatpush1.bf16.msra.mxu1 %v472_v2  ;;  %v481_v13 = vld [vmem:[%s699_s1 + $0x48] sm:$0xff]   ;;  %v482_v14 = vld [vmem:[%s699_s1 + $0x40] sm:$0xff]   ;;  %v491_v20 = vld [vmem:[%s700_s0 + $0x10] ss:$8 sps:$4 sm:$0xff]  }
   0x7   :  { %217 = vmatprep.subr.bf16.mxu0 %v503_v0  ;;  %448 = vmatprep.subr.bf16.mxu1 %v503_v0  ;;  %v486_v16 = vld [vmem:[%s700_s0 + $0x40] ss:$8 sps:$4 sm:$0xff]   ;;  %v494_v21 = vld [vmem:[%s700_s0 + $0x50] ss:$8 sps:$4 sm:$0xff]   ;;  %v495_v22 = vld [vmem:[%s700_s0 + $0x24] ss:$8 sps:$4 sm:$0xff]  }
   0x8   :  { %v27_v19 = vld [vmem:[%s700_s0 + $0x60] sm:$0x11]  ;;  %v500_v26 = vld [vmem:[%s700_s0 + $0x34] ss:$8 sps:$4 sm:$0xff]   ;;  %v502_v27 = vld [vmem:[%s700_s0 + $0x30] ss:$8 sps:$4 sm:$0xff]  }
   0x9   :  { %v400_v23 = vcombine.high %v27_v19, %v27_v19  ;;  %v497_v24 = vld [vmem:[%s700_s0 + $0x20] ss:$8 sps:$4 sm:$0xff]   ;;  %v399_v25 = vcombine.low %v27_v19, %v27_v19 }
   0xa   :  { %218 = vmatpush1.bf16.msra.mxu0 %v473_v3  ;;  %460 = vmatpush1.bf16.msra.mxu1 %v473_v3  ;;  %v633_v28 = vld [vmem:[%s701_s2] ss:$0 sm:$0xff] }
   0xb   :  { %219 = vmatprep.subr.bf16.mxu0 %v503_v0  ;;  %449 = vmatprep.subr.bf16.mxu1 %v503_v0 }
   0xe   :  { %220 = vmatpush1.bf16.msra.mxu0 %v474_v4  ;;  %461 = vmatpush1.bf16.msra.mxu1 %v474_v4 }
   0xf   :  { %221 = vmatprep.subr.bf16.mxu0 %v503_v0  ;;  %450 = vmatprep.subr.bf16.mxu1 %v503_v0 }
  0x12   :  { %222 = vmatpush1.bf16.msra.mxu0 %v475_v6  ;;  %462 = vmatpush1.bf16.msra.mxu1 %v475_v6 }
  0x13   :  { %223 = vmatprep.subr.bf16.mxu0 %v503_v0  ;;  %451 = vmatprep.subr.bf16.mxu1 %v503_v0 }
  0x16   :  { %224 = vmatpush1.bf16.msra.mxu0 %v476_v8  ;;  %463 = vmatpush1.bf16.msra.mxu1 %v476_v8 }
  0x17   :  { %225 = vmatprep.subr.bf16.mxu0 %v503_v0  ;;  %452 = vmatprep.subr.bf16.mxu1 %v503_v0 }
  0x1a   :  { %226 = vmatpush1.bf16.msra.mxu0 %v477_v9  ;;  %464 = vmatpush1.bf16.msra.mxu1 %v477_v9 }
  0x1b   :  { %227 = vmatprep.subr.bf16.mxu0 %v503_v0  ;;  %453 = vmatprep.subr.bf16.mxu1 %v503_v0 }
  0x1e   :  { %228 = vmatpush1.bf16.msra.mxu0 %v478_v10  ;;  %465 = vmatpush1.bf16.msra.mxu1 %v478_v10 }
  0x1f   :  { %237 = vmatprep.subr.bf16.mxu0 %v503_v0  ;;  %454 = vmatprep.subr.bf16.mxu1 %v503_v0 }
  0x22   :  { %238 = vmatpush2.bf16.msra.mxu0 %v479_v11  ;;  %466 = vmatpush2.bf16.msra.mxu1 %v479_v11 }
  0x23   :  { %239 = vmatprep.subr.bf16.mxu0 %v503_v0  ;;  %455 = vmatprep.subr.bf16.mxu1 %v503_v0 }
  0x26   :  { %240 = vmatpush2.bf16.msra.mxu0 %v480_v12  ;;  %467 = vmatpush2.bf16.msra.mxu1 %v480_v12 }
  0x27   :  { %241 = vmatprep.subr.bf16.mxu0 %v503_v0  ;;  %456 = vmatprep.subr.bf16.mxu1 %v503_v0 }
  0x2a   :  { %242 = vmatpush2.bf16.msra.mxu0 %v481_v13  ;;  %468 = vmatpush2.bf16.msra.mxu1 %v481_v13 }
  0x2b   :  { %243 = vmatprep.subr.bf16.mxu0 %v503_v0  ;;  %457 = vmatprep.subr.bf16.mxu1 %v503_v0 }
  0x2e   :  { %244 = vmatpush2.bf16.msra.mxu0 %v482_v14  ;;  %469 = vmatpush2.bf16.msra.mxu1 %v482_v14 }
  0x31   :  { %246 = vmatmul.mubr.bf16.vlgmr.msra.gmra.mxu0 %v483_v15  ;;  %278 = vmatmul.mubr.bf16.vlgmr.msra.gmra.mxu1 %v486_v16 }
  0x32   :  { %414 = vmatprep.mubr.msk.bf16.mxu0 %vm191_vm0, %v489_v17  ;;  %418 = vmatprep.mubr.msk.bf16.mxu1 %vm191_vm0, %v492_v18 }
  0x39   :  { %254 = vmatmul.mubr.bf16.gmra.mxu0 %v491_v20  ;;  %286 = vmatmul.mubr.bf16.gmra.mxu1 %v494_v21 }
  0x3a   :  { %415 = vmatprep.mubr.msk.bf16.mxu0 %vm191_vm0, %v495_v22  ;;  %419 = vmatprep.mubr.msk.bf16.mxu1 %vm191_vm0, %v400_v23 }
  0x41   :  { %262 = vmatmul.mubr.bf16.gmra.mxu0 %v497_v24  ;;  %294 = vmatmul.mubr.bf16.gmra.mxu1 %v399_v25 }
  0x42   :  { %416 = vmatprep.mubr.msk.bf16.mxu0 %vm191_vm0, %v500_v26 }
  0x49   :  { %270 = vmatmul.mubr.bf16.gmra.mxu0 %v502_v27 }
  0xf1   :  { %v247_v29 = vpop.f32.mrf.mxu0  ;;  %v279_v30 = vpop.f32.mrf.mxu1 }
  0xf2   :  { %v248_v31 = vadd.f32 %v633_v28, %v247_v29  ;;  %v280_v32 = vadd.f32 %v633_v28, %v279_v30 }
  0xf3   :  { %v249_v33 = vpop.f32.mrf.mxu0  ;;  %v281_v34 = vpop.f32.mrf.mxu1 }
  0xf4   :  { %v301_v35 = vmax.f32 %v248_v31, 0.0  ;;  %v309_v36 = vmax.f32 %v280_v32, 0.0 }
  0xf5   :  { %v250_v37 = vpop.f32.mrf.mxu0  ;;  %v282_v38 = vpop.f32.mrf.mxu1 }
  0xf6   :  { %v433_v39 = vpack.c.bf16 %v301_v35, %v301_v35  ;;  %v251_v40 = vadd.f32 %v633_v28, %v250_v37  ;;  %v441_v41 = vpack.c.bf16 %v309_v36, %v309_v36  ;;  %v283_v42 = vadd.f32 %v633_v28, %v282_v38 }
  0xf7   :  { %v252_v43 = vpop.f32.mrf.mxu0  ;;  %v284_v44 = vpop.f32.mrf.mxu1 }
  0xf8   :  { %368 = vst.msk [vmem:[%s702_s3] sm:$0xf] %vm367_vm1, %v433_v39  ;;  %v302_v45 = vmax.f32 %v251_v40, 0.0  ;;  %376 = vst.msk [vmem:[%s702_s3 + $0x20] sm:$0xf] %vm367_vm1, %v441_v41  ;;  %v310_v46 = vmax.f32 %v283_v42, 0.0 }
  0xf9   :  { %v255_v47 = vpop.f32.mrf.mxu0  ;;  %v287_v48 = vpop.f32.mrf.mxu1 }
  0xfa   :  { %v434_v49 = vpack.c.bf16 %v302_v45, %v302_v45  ;;  %v256_v50 = vadd.f32 %v633_v28, %v255_v47  ;;  %v442_v51 = vpack.c.bf16 %v310_v46, %v310_v46  ;;  %v288_v52 = vadd.f32 %v633_v28, %v287_v48 }
  0xfb   :  { %v257_v53 = vpop.f32.mrf.mxu0  ;;  %v289_v54 = vpop.f32.mrf.mxu1 }
  0xfc   :  { %369 = vst.msk [vmem:[%s702_s3 + $0x4] sm:$0xf] %vm367_vm1, %v434_v49  ;;  %v303_v55 = vmax.f32 %v256_v50, 0.0  ;;  %377 = vst.msk [vmem:[%s702_s3 + $0x24] sm:$0xf] %vm367_vm1, %v442_v51  ;;  %v311_v56 = vmax.f32 %v288_v52, 0.0 }
  0xfd   :  { %v258_v57 = vpop.f32.mrf.mxu0  ;;  %v290_v58 = vpop.f32.mrf.mxu1 }
  0xfe   :  { %v435_v59 = vpack.c.bf16 %v303_v55, %v303_v55  ;;  %v259_v60 = vadd.f32 %v633_v28, %v258_v57  ;;  %v443_v61 = vpack.c.bf16 %v311_v56, %v311_v56  ;;  %v291_v62 = vadd.f32 %v633_v28, %v290_v58 }
  0xff   :  { %v260_v63 = vpop.f32.mrf.mxu0  ;;  %v292_v0 = vpop.f32.mrf.mxu1 }
 0x100   :  { %370 = vst.msk [vmem:[%s702_s3 + $0x8] sm:$0xf] %vm367_vm1, %v435_v59  ;;  %v304_v1 = vmax.f32 %v259_v60, 0.0  ;;  %378 = vst.msk [vmem:[%s702_s3 + $0x28] sm:$0xf] %vm367_vm1, %v443_v61  ;;  %v312_v2 = vmax.f32 %v291_v62, 0.0 }
 0x101   :  { %v263_v3 = vpop.f32.mrf.mxu0  ;;  %v295_v4 = vpop.f32.mrf.mxu1 }
 0x102   :  { %v436_v5 = vpack.c.bf16 %v304_v1, %v304_v1  ;;  %v264_v6 = vadd.f32 %v633_v28, %v263_v3  ;;  %v444_v7 = vpack.c.bf16 %v312_v2, %v312_v2  ;;  %v296_v8 = vadd.f32 %v633_v28, %v295_v4 }
 0x103   :  { %v265_v9 = vpop.f32.mrf.mxu0  ;;  %v297_v10 = vpop.f32.mrf.mxu1 }
 0x104   :  { %371 = vst.msk [vmem:[%s702_s3 + $0xc] sm:$0xf] %vm367_vm1, %v436_v5  ;;  %v305_v11 = vmax.f32 %v264_v6, 0.0  ;;  %379 = vst.msk [vmem:[%s702_s3 + $0x2c] sm:$0xf] %vm367_vm1, %v444_v7  ;;  %v313_v12 = vmax.f32 %v296_v8, 0.0 }
 0x105   :  { %v266_v13 = vpop.f32.mrf.mxu0  ;;  %v298_v14 = vpop.f32.mrf.mxu1 }
 0x106   :  { %v437_v15 = vpack.c.bf16 %v305_v11, %v305_v11  ;;  %v267_v16 = vadd.f32 %v633_v28, %v266_v13  ;;  %v445_v17 = vpack.c.bf16 %v313_v12, %v313_v12 }
 0x107   :  { %v268_v18 = vpop.f32.mrf.mxu0  ;;  %v299_v19 = vpop.f32.mrf.mxu1 }
 0x108   :  { %372 = vst.msk [vmem:[%s702_s3 + $0x10] sm:$0xf] %vm367_vm1, %v437_v15  ;;  %v306_v20 = vmax.f32 %v267_v16, 0.0 }
 0x109   :  { %381 = vst.msk [vmem:[%s702_s3 + $0x30] sm:$0x1] %vm380_vm2, %v445_v17  ;;  %v271_v21 = vpop.f32.mrf.mxu0 }
 0x10a   :  { %v438_v22 = vpack.c.bf16 %v306_v20, %v306_v20  ;;  %v272_v23 = vadd.f32 %v633_v28, %v271_v21 }
 0x10b   :  { %v273_v24 = vpop.f32.mrf.mxu0 }
 0x10c   :  { %373 = vst.msk [vmem:[%s702_s3 + $0x14] sm:$0xf] %vm367_vm1, %v438_v22  ;;  %v307_v25 = vmax.f32 %v272_v23, 0.0 }
 0x10d   :  { %v274_v26 = vpop.f32.mrf.mxu0 }
 0x10e   :  { %v439_v27 = vpack.c.bf16 %v307_v25, %v307_v25  ;;  %v275_v29 = vadd.f32 %v633_v28, %v274_v26 }
 0x10f   :  { %v276_v30 = vpop.f32.mrf.mxu0 }
 0x110   :  { %374 = vst.msk [vmem:[%s702_s3 + $0x18] sm:$0xf] %vm367_vm1, %v439_v27  ;;  %v308_v31 = vmax.f32 %v275_v29, 0.0 }
 0x112   :  { %v440_v32 = vpack.c.bf16 %v308_v31, %v308_v31 }
 0x114   :  { %375 = vst.msk [vmem:[%s702_s3 + $0x1c] sm:$0xf] %vm367_vm1, %v440_v32 }

// kernel: forward.3
= control target key start
LH: loop header
LB: loop body
LE: loop exit
PB: predicated region body
PF: predicated region fallthrough
CT: control target
= control target key end

     0   :  { %12 = vsyncpa [#allocation4], 0  ;;  %s1084_s24 = smov 0   ;;  %s1236_s0 = inlined_call_operand.vmem [shape: bf16[4,2,256], index: 0, kind: input, shape index: {}]   ;;  %s1237_s1 = inlined_call_operand.vmem [shape: bf16[256,32], index: 1, kind: input, shape index: {}]   ;;  %s1238_s2 = inlined_call_operand.vmem [shape: f32[1,32], index: 2, kind: input, shape index: {}]   ;;  %s1239_s3 = inlined_call_operand.vmem [shape: bf16[4,32,256], index: 3, kind: input, shape index: {}]   ;;  %s1240_s4 = inlined_call_operand.vmem [shape: f32[1,256], index: 4, kind: input, shape index: {}]   ;;  %s1241_s5 = inlined_call_operand.vmem [shape: bf16[256,4], index: 5, kind: input, shape index: {}]   ;;  %s1242_s6 = inlined_call_operand.vmem [shape: f32[1,4], index: 6, kind: input, shape index: {}]   ;;  %s1243_s7 = inlined_call_operand.hbm [shape: f32[2,4], index: 7, kind: output, shape index: {}]  }
   0x1 LB: > { %s1090_s25 = sadd.s32 4294967295, %s1037_s24   ;;  %p851_p0 = scmp.ge.s32.totalorder %s1037_s24, 1  ;;  %s1037_s24 = sphi %s1084_s24, %s18_s24  }
   0x2   : > { %p242_p1 = scmp.lt.s32.totalorder %s1037_s24, 5 }
   0x4   : > { %p243_p2 = pnand %p851_p0, %p242_p1 }
   0x5   : > { %p273_p3 = scmp.lt.s32.totalorder (!%p243_p2), %s1090_s25, 3  ;;  %p855_p4 = scmp.ne.s32.totalorder (!%p243_p2), %s1090_s25, 0 }
   0x6   : > { %246 = sbr.rel (%p243_p2) target bundleno = 705 (0x2c1), region = 48 }
   0xb   : > { %s274_s26 = scalar_select %p273_p3, %s1090_s25, 3 }
   0xc   : > { %286 = sbr.rel (%p855_p4) target bundleno = 19 (0x13), region = 52 }
   0xd   : > { %s852_s27 = sshll.u32 %s274_s26, 1  ;;  %s901_s28 = sshll.u32 %s274_s26, 5 }
   0xe   : > { %s276_s8 = scalar_lea.vmem %s1236_s0, %s852_s27  ;;  %s1102_s11 = scalar_lea.vmem %s1239_s3, %s901_s28 }
  0x11   : > { %v1039_v0 = vmov 0.0  }
  0x12   : > { %287 = vst [vmem:[#allocation2] sm:$0xf] %v1039_v0 }
  0x13 PF: > { %v965_v1 = vld [vmem:[%s1237_s1 + $0x78] sm:$0xff]   ;;  %v967_v3 = vld [vmem:[%s1237_s1 + $0x70] sm:$0xff]   ;;  %v969_v5 = vld [vmem:[%s1237_s1 + $0x68] sm:$0xff]   ;;  %v340_v10 = vlaneseq  ;;  %v1040_v14 = vmov 1966171168   ;;  %v1041_v31 = vmov 0  }
  0x14   : > { %v966_v2 = vld [vmem:[%s1237_s1 + $0x38] sm:$0xff]   ;;  %902 = vmatprep.subr.bf16.mxu0 %v965_v1  ;;  %v968_v4 = vld [vmem:[%s1237_s1 + $0x30] sm:$0xff]   ;;  %v970_v6 = vld [vmem:[%s1237_s1 + $0x28] sm:$0xff]   ;;  %v338_v15 = vunpack.c.l.s4 %v1040_v14  ;;  %552 = vmatprep.mubr.bf16.mxu1 %v1041_v31  ;;  %vm516_vm0 = vcmask 261120   ;;  %v1042_v41 = vmov 1983009808  }
  0x15   : > { %903 = vmatpush3.bf16.msra.mxu0 %v966_v2  ;;  %v971_v7 = vld [vmem:[%s1237_s1 + $0x60] sm:$0xff]   ;;  %v973_v9 = vld [vmem:[%s1237_s1 + $0x58] sm:$0xff]   ;;  %v975_v12 = vld [vmem:[%s1237_s1 + $0x50] sm:$0xff]   ;;  %v1138_v16 = vshrl.u32 %v340_v10, 7  ;;  %v565_v42 = vunpack.c.l.s4 %v1042_v41  ;;  %p879_p5 = scmp.ne.s32.totalorder %s1090_s25, 3 }
  0x16   : > { %904 = vmatprep.subr.bf16.mxu0 %v967_v3  ;;  %v972_v8 = vld [vmem:[%s1237_s1 + $0x20] sm:$0xff]   ;;  %v974_v11 = vld [vmem:[%s1237_s1 + $0x18] sm:$0xff]   ;;  %v976_v17 = vld [vmem:[%s1237_s1 + $0x10] sm:$0xff]   ;;  %v339_v19 = vunpack.c.0.s8 %v338_v15 }
  0x17   : > { %v857_v13 = vld.sshfl [vmem:[%s276_s8] sm:$0x11 pattern:$0x75316420]  ;;  %v977_v20 = vld [vmem:[%s1237_s1 + $0x48] sm:$0xff]   ;;  %v566_v43 = vunpack.c.0.s8 %v565_v42 }
  0x18   : > { %v336_v18 = vcombine.high %v857_v13, %v857_v13  ;;  %v342_v21 = vsub.s32 %v339_v19, %v1138_v16  ;;  %v978_v22 = vld [vmem:[%s1237_s1 + $0x8] sm:$0xff]   ;;  %v979_v24 = vld [vmem:[%s1237_s1 + $0x40] sm:$0xff]   ;;  %v981_v27 = vld [vmem:[%s1102_s11 + $0x14] ss:$8 sps:$4 sm:$0xff]  }
  0x19   : > { %905 = vmatpush3.bf16.msra.mxu0 %v968_v4  ;;  %v980_v25 = vld [vmem:[%s1237_s1] sm:$0xff]   ;;  %v983_v28 = vld [vmem:[%s1102_s11 + $0x10] ss:$8 sps:$4 sm:$0xff]   ;;  %532 = vmatprep.subr.bf16.mxu1 %v981_v27  ;;  %v569_v45 = vsub.s32 %v566_v43, %v1138_v16 }
  0x1a   : > { %906 = vmatprep.subr.bf16.mxu0 %v969_v5  ;;  %v350_v23 = vrot.slane %v336_v18, %v342_v21  ;;  %v343_v26 = vrot.slane %v857_v13, %v342_v21  ;;  %533 = vmatpush1.bf16.msra.mxu1 %v983_v28  ;;  %v984_v29 = vld [vmem:[%s1102_s11 + $0x4] ss:$8 sps:$4 sm:$0xff]   ;;  %v986_v30 = vld [vmem:[%s1102_s11] ss:$8 sps:$4 sm:$0xff]  }
  0x1b   : > { %534 = vmatprep.subr.bf16.mxu1 %v984_v29  ;;  %v856_v33 = vld [vmem:[%s1238_s2] ss:$0 sm:$0xff] }
  0x1c   : > { %481 = vmatprep.mubr.bf16.mxu0 %v350_v23  ;;  %v490_v48 = vld [vmem:[#allocation2] sm:$0xf] }
  0x1d   : > { %907 = vmatpush3.bf16.msra.mxu0 %v970_v6 }
  0x1e   : > { %908 = vmatprep.subr.bf16.mxu0 %v971_v7  ;;  %535 = vmatpush1.bf16.msra.mxu1 %v986_v30 }
  0x21   : > { %909 = vmatpush3.bf16.msra.mxu0 %v972_v8 }
  0x22   : > { %910 = vmatprep.subr.bf16.mxu0 %v973_v9 }
  0x25   : > { %911 = vmatpush3.bf16.msra.mxu0 %v974_v11 }
  0x26   : > { %912 = vmatprep.subr.bf16.mxu0 %v975_v12 }
  0x29   : > { %913 = vmatpush3.bf16.msra.mxu0 %v976_v17 }
  0x2a   : > { %914 = vmatprep.subr.bf16.mxu0 %v977_v20 }
  0x2d   : > { %915 = vmatpush3.bf16.msra.mxu0 %v978_v22 }
  0x2e   : > { %916 = vmatprep.subr.bf16.mxu0 %v979_v24 }
  0x31   : > { %917 = vmatpush3.bf16.msra.mxu0 %v980_v25 }
  0x34   : > { %482 = vmatmul.mubr.bf16.vlgmr.msra.gmra.mxu0 %v343_v26 }
  0xf4   : > { %v918_v32 = vpop.f32.mrf.mxu0 }
  0xf6   : > { %v919_v34 = vpop.f32.mrf.mxu0 }
  0xf7   : > { %v920_v35 = vadd.f32 %v919_v34, %v918_v32 }
  0xf8   : > { %v921_v36 = vpop.f32.mrf.mxu0 }
  0xf9   : > { %v484_v37 = vadd.f32 %v920_v35, %v856_v33 }
  0xfa   : > { %v922_v38 = vpop.f32.mrf.mxu0 }
  0xfb   : > { %v489_v39 = vmax.f32 %v484_v37, 0.0 }
  0xfd   : > { %v491_v40 = vpack.c.bf16 %v489_v39, %v489_v39 }
  0xff   : > { %878 = vmatmul.mubr.msk.bf16.vlgmr.msra.gmra.mxu1 %vm516_vm0, %v491_v40 }
 0x1bf   : > { %v554_v44 = vpop.f32.mrf.mxu1 }
 0x1c1   : > { %v556_v46 = vpop.f32.mrf.mxu1 }
 0x1c2   : > { %v563_v47 = vcombine.low %v554_v44, %v556_v46 }
 0x1c3   : > { %v558_v49 = vpop.f32.mrf.mxu1 }
 0x1c4   : > { %v570_v50 = vrot.slane %v563_v47, %v569_v45  ;;  %577 = sbr.rel (%p879_p5) target bundleno = 690 (0x2b2), region = 56 }
 0x1c5   : > { %v559_v51 = vpop.f32.mrf.mxu1 }
 0x1c6   : > { %v572_v52 = vadd.f32 %v570_v50, %v490_v48 }
 0x1c8   : > { %573 = vst [vmem:[#allocation2] sm:$0xf] %v572_v52 }
 0x1c9   : > { %v987_v53 = vld [vmem:[%s1241_s5 + $0x78] sm:$0xff]   ;;  %v989_v55 = vld [vmem:[%s1241_s5 + $0x70] sm:$0xff]   ;;  %v991_v57 = vld [vmem:[%s1241_s5 + $0x68] sm:$0xff]   ;;  %v583_v62 = vsub.s32 0, %v1138_v16  ;;  %v587_v63 = vsub.s32 1, %v1138_v16  ;;  %vm788_vm1 = vcmask 25600  }
 0x1ca   : > { %v988_v54 = vld [vmem:[%s1241_s5 + $0x38] sm:$0xff]   ;;  %924 = vmatprep.subr.bf16.mxu0 %v987_v53  ;;  %v990_v56 = vld [vmem:[%s1241_s5 + $0x30] sm:$0xff]   ;;  %v992_v58 = vld [vmem:[%s1241_s5 + $0x28] sm:$0xff]  }
 0x1cb   : > { %925 = vmatpush3.bf16.msra.mxu0 %v988_v54  ;;  %v993_v59 = vld [vmem:[%s1241_s5 + $0x60] sm:$0xff]   ;;  %v995_v61 = vld [vmem:[%s1241_s5 + $0x58] sm:$0xff]   ;;  %v997_v1 = vld [vmem:[%s1241_s5 + $0x50] sm:$0xff]  }
 0x1cc   : > { %926 = vmatprep.subr.bf16.mxu0 %v989_v55  ;;  %v994_v60 = vld [vmem:[%s1241_s5 + $0x20] sm:$0xff]   ;;  %v996_v0 = vld [vmem:[%s1241_s5 + $0x18] sm:$0xff]   ;;  %v998_v5 = vld [vmem:[%s1241_s5 + $0x10] sm:$0xff]  }
 0x1cd   : > { %v579_v2 = vld [vmem:[%s1240_s4] sm:$0x3]  ;;  %v999_v7 = vld [vmem:[%s1241_s5 + $0x48] sm:$0xff]  }
 0x1ce   : > { %v584_v3 = vrot.slane %v579_v2, %v583_v62  ;;  %v588_v4 = vrot.slane %v579_v2, %v587_v63  ;;  %v1000_v10 = vld [vmem:[%s1241_s5 + $0x8] sm:$0xff]   ;;  %v1001_v12 = vld [vmem:[%s1241_s5 + $0x40] sm:$0xff]  }
 0x1cf   : > { %927 = vmatpush3.bf16.msra.mxu0 %v990_v56  ;;  %v578_v8 = vld [vmem:[#allocation2] sm:$0xf] }
 0x1d0   : > { %928 = vmatprep.subr.bf16.mxu0 %v991_v57  ;;  %v589_v6 = vcombine.low %v584_v3, %v588_v4  ;;  %v1002_v14 = vld [vmem:[%s1241_s5] sm:$0xff]  }
 0x1d1   : > { %v880_v20 = vld [vmem:[%s1242_s6] ss:$0 sm:$0xff] }
 0x1d2   : > { %v596_v9 = vrot.slane %v589_v6, %v569_v45 }
 0x1d3   : > { %929 = vmatpush3.bf16.msra.mxu0 %v992_v58 }
 0x1d4   : > { %930 = vmatprep.subr.bf16.mxu0 %v993_v59  ;;  %v598_v11 = vadd.f32 %v596_v9, %v578_v8 }
 0x1d6   : > { %v599_v13 = vmax.f32 %v598_v11, 0.0 }
 0x1d7   : > { %931 = vmatpush3.bf16.msra.mxu0 %v994_v60 }
 0x1d8   : > { %932 = vmatprep.subr.bf16.mxu0 %v995_v61  ;;  %v607_v15 = vrot.slane %v599_v13, %v569_v45 }
 0x1da   : > { %v608_v16 = vcombine.high %v607_v15, %v607_v15  ;;  %v611_v17 = vpack.c.bf16 %v607_v15, %v607_v15 }
 0x1db   : > { %933 = vmatpush3.bf16.msra.mxu0 %v996_v0 }
 0x1dc   : > { %934 = vmatprep.subr.bf16.mxu0 %v997_v1  ;;  %v612_v18 = vpack.c.bf16 %v608_v16, %v608_v16 }
 0x1de   : > { %780 = vmatprep.mubr.bf16.mxu0 %v612_v18 }
 0x1df   : > { %935 = vmatpush3.bf16.msra.mxu0 %v998_v5 }
 0x1e0   : > { %936 = vmatprep.subr.bf16.mxu0 %v999_v7 }
 0x1e3   : > { %937 = vmatpush3.bf16.msra.mxu0 %v1000_v10 }
 0x1e4   : > { %938 = vmatprep.subr.bf16.mxu0 %v1001_v12 }
 0x1e7   : > { %939 = vmatpush3.bf16.msra.mxu0 %v1002_v14 }
 0x1ea   : > { %781 = vmatmul.mubr.bf16.vlgmr.msra.gmra.mxu0 %v611_v17 }
 0x2aa   : > { %v940_v19 = vpop.f32.mrf.mxu0 }
 0x2ac   : > { %v941_v21 = vpop.f32.mrf.mxu0 }
 0x2ad   : > { %v942_v22 = vadd.f32 %v941_v21, %v940_v19 }
 0x2ae   : > { %v943_v23 = vpop.f32.mrf.mxu0 }
 0x2af   : > { %v783_v24 = vadd.f32 %v942_v22, %v880_v20 }
 0x2b0   : > { %v944_v25 = vpop.f32.mrf.mxu0 }
 0x2b1   : > { %789 = vst.msk [vmem:[#allocation3] sm:$0x3] %vm788_vm1, %v783_v24 }
 0x2b2 PF: > { %p950_p6 = scmp.eq.s32.totalorder %s1090_s25, 3  ;;  %s1043_s20 = smov [#allocation3]  }
 0x2b3   : > { %s797_s21 = sshll.u32 %s1043_s20, 4  ;;  %s798_s21 = int_to_ptr.vmem [resolvable:$true] %s797_s21 }
 0x2b4   : > { %s1003_s22 = scalar_lea.vmem %s798_s21, 32  ;;  %p1010_p10 = scmp.lt.s32.totalorder %s798_s21, %s798_s21 }
 0x2b5   : > { %p1004_p7 = scmp.ne.s32.totalorder %s798_s21, %s1003_s22  ;;  %p1011_p11 = scmp.lt.s32.totalorder %s1003_s22, %s1003_s22 }
 0x2b7   : > { %p1005_p8 = pnand %p1004_p7, %p950_p6  ;;  %p1012_p12 = por %p1011_p11, %p1010_p10 }
 0x2b9   : > { %p1006_p9 = pneg %p1005_p8 }
 0x2bb   : > { %p1013_p13 = pnand %p1012_p12, %p1006_p9 }
 0x2bd   : > { %1016 = shalt.err (!%p1013_p13)
}
 0x2be   : > { %947 = dma.vmem_to_hbm [thread:$0]  (%p950_p6), %s798_s21, 32, %s1243_s7, [#allocation4]  }
 0x2bf   : > { %1032 = dma.done.wait (%p950_p6), [#allocation4], 32  }
 0x2c0   : > { %1034 = vsyncadd (%p950_p6), [#allocation4], 4294967264 }
 0x2c1 PF: > { %s18_s24 = sadd.s32 1, %s1037_s24  }
 0x2c2   : > { %p15_p0 = scmp.ge.s32.totalorder %s18_s24, 6  }
 0x2c4   :  { %17 = sbr.rel (!%p15_p0) target bundleno = 1 (0x1), region = 86 }
 0x2c9   :  { %810 = vsyncpa [#allocation4], 1 }
 0x2ca   :  { %812 = vsyncpa [#allocation4 + $0x1], 1 }

</bundles_post_ra>
